<compile_context>
chip_gen: v5e
topology: v5e:2x2
jax: 0.10.0
libtpu: 0.0.40
codegen_flags: <defaults>
</compile_context>

<pallas_src>
import jax
import jax.numpy as jnp
from jax import lax
from jax.experimental import pallas as pl
from jax.experimental.pallas import tpu as pltpu


# ----------------------------------------------------------------------------
# Helpers
# ----------------------------------------------------------------------------
def _round_up(x, m):
    return ((x + m - 1) // m) * m


def _pick_time_chunk(seq_len, bp, ip, hp, op, max_chunk=32,
                     vmem_budget_bytes=24 * 1024 * 1024):
    """Largest T <= max_chunk dividing seq_len whose working set fits the budget."""
    def bytes_for(t):
        words = (
            2 * t * bp * ip                      # x chunk (double-buffered)
            + 2 * t * bp * op                    # y chunk (double-buffered)
            + t * bp * hp                        # z/h chunk scratch (reused in place)
            + bp * hp                            # hidden carry
            + 2 * (ip * hp + hp * hp + hp * op + hp + op)  # resident weights + biases
        )
        return words * 4                          # float32
    t = min(seq_len, max_chunk)
    while t > 1 and (seq_len % t != 0 or bytes_for(t) > vmem_budget_bytes):
        t -= 1
    return t


# ----------------------------------------------------------------------------
# Fused kernel: input projection + recurrence + output head per time chunk
# ----------------------------------------------------------------------------
def _fused_rnn_kernel(x_ref, w_ih_ref, b_in_ref, w_hh_ref, w_out_ref, b_out_ref,
                      y_ref, h_carry, zh_buf):
    # x_ref:    (T*Bp, I)   chunk of inputs (rows = time-major, Bp rows per step)
    # w_ih_ref: (I,  Hp)    W_ih^T, resident
    # b_in_ref: (1,  Hp)    b_ih + b_hh, pre-summed
    # w_hh_ref: (Hp, Hp)    W_hh^T, resident
    # w_out_ref:(Hp, Op)    W_out^T, resident
    # b_out_ref:(1,  Op)
    # y_ref:    (T*Bp, Op)  chunk of outputs
    # h_carry:  (Bp, Hp)    VMEM scratch carrying h across grid steps
    # zh_buf:   (T*Bp, Hp)  VMEM scratch: holds z, overwritten in place by h
    Bp, Hp = h_carry.shape
    T = x_ref.shape[0] // Bp

    @pl.when(pl.program_id(0) == 0)
    def _():
        h_carry[...] = jnp.zeros_like(h_carry)          # h_0 = 0

    # Stage A: input projection for the whole chunk (one MXU pass, bias pre-summed).
    zh_buf[...] = (
        jnp.dot(x_ref[...], w_ih_ref[...], preferred_element_type=jnp.float32)
        + b_in_ref[...])

    whh = w_hh_ref[...]                                  # resident recurrent weight

    # Stage B: serial recurrence. Only the (Bp,Hp)@(Hp,Hp) matmul + relu sit on the
    # serial path. Static Python loop -> fully unrolled, static 8-aligned slab offsets.
    h = h_carry[...]
    for t in range(T):
        rows = pl.ds(t * Bp, Bp)
        h = jnp.maximum(
            zh_buf[rows, :] + jnp.dot(h, whh, preferred_element_type=jnp.float32),
            0.0)
        zh_buf[rows, :] = h                              # overwrite z slab with h slab
    h_carry[...] = h

    # Stage C: output projection for the whole chunk (one MXU pass, lane-dense store).
    y_ref[...] = (
        jnp.dot(zh_buf[...], w_out_ref[...], preferred_element_type=jnp.float32)
        + b_out_ref[...]).astype(y_ref.dtype)


# ----------------------------------------------------------------------------
# Full forward pass
# ----------------------------------------------------------------------------
def rnn_model_forward(x, params):
    """x: (seq_len, batch, input_size) f32 -> (seq_len, batch, output_size) f32."""
    S, B, I = x.shape
    w_ih, w_hh = params["w_ih"], params["w_hh"]
    b_ih, b_hh = params["b_ih"], params["b_hh"]
    w_out, b_out = params["w_out"], params["b_out"]
    H = w_ih.shape[0]
    O = w_out.shape[0]

    Bp = _round_up(B, 8)        # sublane-aligned batch (only x pad needed)
    Hp = _round_up(H, 128)      # lane-aligned hidden
    Op = _round_up(O, 128)      # lane-aligned output (lane-dense stores)

    # One-time layout plumbing (outside the recurrence). Zero padding is inert:
    # padded hidden/output lanes stay exactly zero; padded batch rows never mix
    # with real rows and are sliced off at the end.
    x_p = jnp.pad(x, ((0, 0), (0, Bp - B), (0, 0))) if Bp != B else x
    x2d = x_p.reshape(S * Bp, I)                                        # free collapse
    w_ih_t = jnp.pad(w_ih.T, ((0, 0), (0, Hp - H)))                     # (I, Hp)
    b_in = jnp.pad((b_ih + b_hh).reshape(1, H), ((0, 0), (0, Hp - H)))  # pre-summed
    w_hh_t = jnp.pad(w_hh.T, ((0, Hp - H), (0, Hp - H)))                # (Hp, Hp)
    w_out_t = jnp.pad(w_out.T, ((0, Hp - H), (0, Op - O)))              # (Hp, Op)
    b_out_p = jnp.pad(b_out.reshape(1, O), ((0, 0), (0, Op - O)))       # (1, Op)

    T = _pick_time_chunk(S, Bp, I, Hp, Op)

    y2d = pl.pallas_call(
        _fused_rnn_kernel,
        out_shape=jax.ShapeDtypeStruct((S * Bp, Op), jnp.float32),
        grid_spec=pltpu.PrefetchScalarGridSpec(
            num_scalar_prefetch=0,
            grid=(S // T,),
            in_specs=[
                pl.BlockSpec((T * Bp, I), lambda c: (c, 0)),    # x chunk
                pl.BlockSpec((I, Hp), lambda c: (0, 0)),        # W_ih^T (resident)
                pl.BlockSpec((1, Hp), lambda c: (0, 0)),        # b_ih + b_hh
                pl.BlockSpec((Hp, Hp), lambda c: (0, 0)),       # W_hh^T (resident)
                pl.BlockSpec((Hp, Op), lambda c: (0, 0)),       # W_out^T (resident)
                pl.BlockSpec((1, Op), lambda c: (0, 0)),        # b_out
            ],
            out_specs=pl.BlockSpec((T * Bp, Op), lambda c: (c, 0)),
            scratch_shapes=[
                pltpu.VMEM((Bp, Hp), jnp.float32),              # hidden carry
                pltpu.VMEM((T * Bp, Hp), jnp.float32),          # z/h chunk buffer
            ],
        ),
        compiler_params=pltpu.CompilerParams(
            dimension_semantics=("arbitrary",),                 # true sequential recurrence
            vmem_limit_bytes=32 * 1024 * 1024,                  # > v5e 16 MiB scoped default
        ),
    )(x2d, w_ih_t, b_in, w_hh_t, w_out_t, b_out_p)

    return y2d.reshape(S, Bp, Op)[:, :B, :O]


# ----------------------------------------------------------------------------
# Pure-JAX reference + init (matches PyTorch nn.RNN(relu) + nn.Linear)
# ----------------------------------------------------------------------------
def rnn_model_reference(x, params):
    w_ih, w_hh = params["w_ih"], params["w_hh"]
    b_ih, b_hh = params["b_ih"], params["b_hh"]
    w_out, b_out = params["w_out"], params["b_out"]
    B = x.shape[1]
    H = w_ih.shape[0]

    def step(h, x_t):
        h_new = jnp.maximum(x_t @ w_ih.T + b_ih + h @ w_hh.T + b_hh, 0.0)
        return h_new, h_new

    h0 = jnp.zeros((B, H), jnp.float32)
    _, ys = lax.scan(step, h0, x)
    return ys @ w_out.T + b_out


def init_params(key, input_size, hidden_size, output_size):
    """Deterministic init mimicking PyTorch's U(-1/sqrt(H), 1/sqrt(H))."""
    ks = jax.random.split(key, 6)
    k_rnn = 1.0 / jnp.sqrt(hidden_size)
    k_lin = 1.0 / jnp.sqrt(hidden_size)
    u = lambda k, shape, s: jax.random.uniform(k, shape, jnp.float32, -s, s)
    return {
        "w_ih": u(ks[0], (hidden_size, input_size), k_rnn),
        "w_hh": u(ks[1], (hidden_size, hidden_size), k_rnn),
        "b_ih": u(ks[2], (hidden_size,), k_rnn),
        "b_hh": u(ks[3], (hidden_size,), k_rnn),
        "w_out": u(ks[4], (output_size, hidden_size), k_lin),
        "b_out": u(ks[5], (output_size,), k_lin),
    }


if __name__ == "__main__":
    SEQ, BATCH = 8, 4
    INPUT_SIZE, HIDDEN_SIZE, OUTPUT_SIZE = 16, 32, 16

    key = jax.random.PRNGKey(0)
    k_x, k_p = jax.random.split(key)
    x = jax.random.normal(k_x, (SEQ, BATCH, INPUT_SIZE), jnp.float32)
    params = init_params(k_p, INPUT_SIZE, HIDDEN_SIZE, OUTPUT_SIZE)

    fwd = jax.jit(rnn_model_forward)
    out = jax.block_until_ready(fwd(x, params))

    ref = rnn_model_reference(x, params)
    assert out.shape == (SEQ, BATCH, OUTPUT_SIZE)
    assert jnp.allclose(out, ref, atol=1e-4, rtol=1e-4), "mismatch vs reference"

    print("KERNEL_OK")
</pallas_src>

<mosaic_0001>
module attributes {stable_mosaic.version = 11 : i64} {
  func.func @_fused_rnn_kernel(%arg0: i32, %arg1: memref<64x16xf32, #tpu.memory_space<vmem>>, %arg2: memref<16x128xf32, #tpu.memory_space<vmem>>, %arg3: memref<1x128xf32, #tpu.memory_space<vmem>>, %arg4: memref<128x128xf32, #tpu.memory_space<vmem>>, %arg5: memref<128x128xf32, #tpu.memory_space<vmem>>, %arg6: memref<1x128xf32, #tpu.memory_space<vmem>>, %arg7: memref<64x128xf32, #tpu.memory_space<vmem>>, %arg8: memref<8x128xf32, #tpu.memory_space<vmem>>, %arg9: memref<64x128xf32, #tpu.memory_space<vmem>>) attributes {dimension_semantics = [#tpu.dimension_semantics<arbitrary>], iteration_bounds = array<i64: 1>, scalar_prefetch = 0 : i64, scratch_operands = 2 : i64, tpu.core_type = #tpu.core_type<tc>, window_params = [{transform_indices = @transform_0, window_bounds = array<i64: 64, 16>}, {pipeline_mode = #tpu.pipeline_mode<synchronous>, transform_indices = @transform_1, window_bounds = array<i64: 16, 128>}, {pipeline_mode = #tpu.pipeline_mode<synchronous>, transform_indices = @transform_2, window_bounds = array<i64: 1, 128>}, {pipeline_mode = #tpu.pipeline_mode<synchronous>, transform_indices = @transform_3, window_bounds = array<i64: 128, 128>}, {pipeline_mode = #tpu.pipeline_mode<synchronous>, transform_indices = @transform_4, window_bounds = array<i64: 128, 128>}, {pipeline_mode = #tpu.pipeline_mode<synchronous>, transform_indices = @transform_5, window_bounds = array<i64: 1, 128>}, {transform_indices = @transform_6, window_bounds = array<i64: 64, 128>}]} {
    %c0_i32 = arith.constant 0 : i32
    %0 = arith.cmpi eq, %arg0, %c0_i32 : i32
    %1 = arith.extui %0 : i1 to i32
    %c0_i32_0 = arith.constant 0 : i32
    %2 = arith.cmpi ne, %1, %c0_i32_0 : i32
    scf.if %2 {
      %cst_64 = arith.constant 0.000000e+00 : f32
      %68 = vector.broadcast %cst_64 : f32 to vector<8x128xf32>
      %c0_65 = arith.constant 0 : index
      %c0_66 = arith.constant 0 : index
      %69 = vector.load %arg8[%c0_65, %c0_66] : memref<8x128xf32, #tpu.memory_space<vmem>>, vector<8x128xf32>
      tpu.vector_store %arg8[%c0_65, %c0_66], %68 {strides = array<i32>} : memref<8x128xf32, #tpu.memory_space<vmem>>, vector<8x128xf32>,
    } else {
    }
    %c0 = arith.constant 0 : index
    %c0_1 = arith.constant 0 : index
    %3 = vector.load %arg1[%c0, %c0_1] : memref<64x16xf32, #tpu.memory_space<vmem>>, vector<64x16xf32>
    %c0_2 = arith.constant 0 : index
    %c0_3 = arith.constant 0 : index
    %4 = vector.load %arg2[%c0_2, %c0_3] : memref<16x128xf32, #tpu.memory_space<vmem>>, vector<16x128xf32>
    %cst = arith.constant dense<0.000000e+00> : vector<64x128xf32>
    %5 = tpu.matmul %3, %4, %cst {dimension_numbers = #tpu.dot_dimension_numbers<[1], [0], [0], [1], [0, 0, 1, 1], [], []>} : vector<64x16xf32>, vector<16x128xf32>, vector<64x128xf32> -> vector<64x128xf32>
    %c0_4 = arith.constant 0 : index
    %c0_5 = arith.constant 0 : index
    %6 = vector.load %arg3[%c0_4, %c0_5] : memref<1x128xf32, #tpu.memory_space<vmem>>, vector<1x128xf32>
    %7 = vector.broadcast %6 : vector<1x128xf32> to vector<64x128xf32>
    %8 = arith.addf %5, %7 : vector<64x128xf32>
    %c0_6 = arith.constant 0 : index
    %c0_7 = arith.constant 0 : index
    %9 = vector.load %arg9[%c0_6, %c0_7] : memref<64x128xf32, #tpu.memory_space<vmem>>, vector<64x128xf32>
    tpu.vector_store %arg9[%c0_6, %c0_7], %8 {strides = array<i32>} : memref<64x128xf32, #tpu.memory_space<vmem>>, vector<64x128xf32>,
    %c0_8 = arith.constant 0 : index
    %c0_9 = arith.constant 0 : index
    %10 = vector.load %arg4[%c0_8, %c0_9] : memref<128x128xf32, #tpu.memory_space<vmem>>, vector<128x128xf32>
    %c0_10 = arith.constant 0 : index
    %c0_11 = arith.constant 0 : index
    %11 = vector.load %arg8[%c0_10, %c0_11] : memref<8x128xf32, #tpu.memory_space<vmem>>, vector<8x128xf32>
    %c0_12 = arith.constant 0 : index
    %c0_13 = arith.constant 0 : index
    %12 = vector.load %arg9[%c0_12, %c0_13] : memref<64x128xf32, #tpu.memory_space<vmem>>, vector<8x128xf32>
    %cst_14 = arith.constant dense<0.000000e+00> : vector<8x128xf32>
    %13 = tpu.matmul %11, %10, %cst_14 {dimension_numbers = #tpu.dot_dimension_numbers<[1], [0], [0], [1], [0, 0, 1, 1], [], []>} : vector<8x128xf32>, vector<128x128xf32>, vector<8x128xf32> -> vector<8x128xf32>
    %14 = arith.addf %12, %13 : vector<8x128xf32>
    %cst_15 = arith.constant 0.000000e+00 : f32
    %15 = vector.broadcast %cst_15 : f32 to vector<8x128xf32>
    %16 = arith.maximumf %14, %15 : vector<8x128xf32>
    %c0_16 = arith.constant 0 : index
    %c0_17 = arith.constant 0 : index
    %17 = vector.load %arg9[%c0_16, %c0_17] : memref<64x128xf32, #tpu.memory_space<vmem>>, vector<8x128xf32>
    tpu.vector_store %arg9[%c0_16, %c0_17], %16 {strides = array<i32>} : memref<64x128xf32, #tpu.memory_space<vmem>>, vector<8x128xf32>,
    %c8 = arith.constant 8 : index
    %c0_18 = arith.constant 0 : index
    %18 = vector.load %arg9[%c8, %c0_18] : memref<64x128xf32, #tpu.memory_space<vmem>>, vector<8x128xf32>
    %cst_19 = arith.constant dense<0.000000e+00> : vector<8x128xf32>
    %19 = tpu.matmul %16, %10, %cst_19 {dimension_numbers = #tpu.dot_dimension_numbers<[1], [0], [0], [1], [0, 0, 1, 1], [], []>} : vector<8x128xf32>, vector<128x128xf32>, vector<8x128xf32> -> vector<8x128xf32>
    %20 = arith.addf %18, %19 : vector<8x128xf32>
    %cst_20 = arith.constant 0.000000e+00 : f32
    %21 = vector.broadcast %cst_20 : f32 to vector<8x128xf32>
    %22 = arith.maximumf %20, %21 : vector<8x128xf32>
    %c8_21 = arith.constant 8 : index
    %c0_22 = arith.constant 0 : index
    %23 = vector.load %arg9[%c8_21, %c0_22] : memref<64x128xf32, #tpu.memory_space<vmem>>, vector<8x128xf32>
    tpu.vector_store %arg9[%c8_21, %c0_22], %22 {strides = array<i32>} : memref<64x128xf32, #tpu.memory_space<vmem>>, vector<8x128xf32>,
    %c16 = arith.constant 16 : index
    %c0_23 = arith.constant 0 : index
    %24 = vector.load %arg9[%c16, %c0_23] : memref<64x128xf32, #tpu.memory_space<vmem>>, vector<8x128xf32>
    %cst_24 = arith.constant dense<0.000000e+00> : vector<8x128xf32>
    %25 = tpu.matmul %22, %10, %cst_24 {dimension_numbers = #tpu.dot_dimension_numbers<[1], [0], [0], [1], [0, 0, 1, 1], [], []>} : vector<8x128xf32>, vector<128x128xf32>, vector<8x128xf32> -> vector<8x128xf32>
    %26 = arith.addf %24, %25 : vector<8x128xf32>
    %cst_25 = arith.constant 0.000000e+00 : f32
    %27 = vector.broadcast %cst_25 : f32 to vector<8x128xf32>
    %28 = arith.maximumf %26, %27 : vector<8x128xf32>
    %c16_26 = arith.constant 16 : index
    %c0_27 = arith.constant 0 : index
    %29 = vector.load %arg9[%c16_26, %c0_27] : memref<64x128xf32, #tpu.memory_space<vmem>>, vector<8x128xf32>
    tpu.vector_store %arg9[%c16_26, %c0_27], %28 {strides = array<i32>} : memref<64x128xf32, #tpu.memory_space<vmem>>, vector<8x128xf32>,
    %c24 = arith.constant 24 : index
    %c0_28 = arith.constant 0 : index
    %30 = vector.load %arg9[%c24, %c0_28] : memref<64x128xf32, #tpu.memory_space<vmem>>, vector<8x128xf32>
    %cst_29 = arith.constant dense<0.000000e+00> : vector<8x128xf32>
    %31 = tpu.matmul %28, %10, %cst_29 {dimension_numbers = #tpu.dot_dimension_numbers<[1], [0], [0], [1], [0, 0, 1, 1], [], []>} : vector<8x128xf32>, vector<128x128xf32>, vector<8x128xf32> -> vector<8x128xf32>
    %32 = arith.addf %30, %31 : vector<8x128xf32>
    %cst_30 = arith.constant 0.000000e+00 : f32
    %33 = vector.broadcast %cst_30 : f32 to vector<8x128xf32>
    %34 = arith.maximumf %32, %33 : vector<8x128xf32>
    %c24_31 = arith.constant 24 : index
    %c0_32 = arith.constant 0 : index
    %35 = vector.load %arg9[%c24_31, %c0_32] : memref<64x128xf32, #tpu.memory_space<vmem>>, vector<8x128xf32>
    tpu.vector_store %arg9[%c24_31, %c0_32], %34 {strides = array<i32>} : memref<64x128xf32, #tpu.memory_space<vmem>>, vector<8x128xf32>,
    %c32 = arith.constant 32 : index
    %c0_33 = arith.constant 0 : index
    %36 = vector.load %arg9[%c32, %c0_33] : memref<64x128xf32, #tpu.memory_space<vmem>>, vector<8x128xf32>
    %cst_34 = arith.constant dense<0.000000e+00> : vector<8x128xf32>
    %37 = tpu.matmul %34, %10, %cst_34 {dimension_numbers = #tpu.dot_dimension_numbers<[1], [0], [0], [1], [0, 0, 1, 1], [], []>} : vector<8x128xf32>, vector<128x128xf32>, vector<8x128xf32> -> vector<8x128xf32>
    %38 = arith.addf %36, %37 : vector<8x128xf32>
    %cst_35 = arith.constant 0.000000e+00 : f32
    %39 = vector.broadcast %cst_35 : f32 to vector<8x128xf32>
    %40 = arith.maximumf %38, %39 : vector<8x128xf32>
    %c32_36 = arith.constant 32 : index
    %c0_37 = arith.constant 0 : index
    %41 = vector.load %arg9[%c32_36, %c0_37] : memref<64x128xf32, #tpu.memory_space<vmem>>, vector<8x128xf32>
    tpu.vector_store %arg9[%c32_36, %c0_37], %40 {strides = array<i32>} : memref<64x128xf32, #tpu.memory_space<vmem>>, vector<8x128xf32>,
    %c40 = arith.constant 40 : index
    %c0_38 = arith.constant 0 : index
    %42 = vector.load %arg9[%c40, %c0_38] : memref<64x128xf32, #tpu.memory_space<vmem>>, vector<8x128xf32>
    %cst_39 = arith.constant dense<0.000000e+00> : vector<8x128xf32>
    %43 = tpu.matmul %40, %10, %cst_39 {dimension_numbers = #tpu.dot_dimension_numbers<[1], [0], [0], [1], [0, 0, 1, 1], [], []>} : vector<8x128xf32>, vector<128x128xf32>, vector<8x128xf32> -> vector<8x128xf32>
    %44 = arith.addf %42, %43 : vector<8x128xf32>
    %cst_40 = arith.constant 0.000000e+00 : f32
    %45 = vector.broadcast %cst_40 : f32 to vector<8x128xf32>
    %46 = arith.maximumf %44, %45 : vector<8x128xf32>
    %c40_41 = arith.constant 40 : index
    %c0_42 = arith.constant 0 : index
    %47 = vector.load %arg9[%c40_41, %c0_42] : memref<64x128xf32, #tpu.memory_space<vmem>>, vector<8x128xf32>
    tpu.vector_store %arg9[%c40_41, %c0_42], %46 {strides = array<i32>} : memref<64x128xf32, #tpu.memory_space<vmem>>, vector<8x128xf32>,
    %c48 = arith.constant 48 : index
    %c0_43 = arith.constant 0 : index
    %48 = vector.load %arg9[%c48, %c0_43] : memref<64x128xf32, #tpu.memory_space<vmem>>, vector<8x128xf32>
    %cst_44 = arith.constant dense<0.000000e+00> : vector<8x128xf32>
    %49 = tpu.matmul %46, %10, %cst_44 {dimension_numbers = #tpu.dot_dimension_numbers<[1], [0], [0], [1], [0, 0, 1, 1], [], []>} : vector<8x128xf32>, vector<128x128xf32>, vector<8x128xf32> -> vector<8x128xf32>
    %50 = arith.addf %48, %49 : vector<8x128xf32>
    %cst_45 = arith.constant 0.000000e+00 : f32
    %51 = vector.broadcast %cst_45 : f32 to vector<8x128xf32>
    %52 = arith.maximumf %50, %51 : vector<8x128xf32>
    %c48_46 = arith.constant 48 : index
    %c0_47 = arith.constant 0 : index
    %53 = vector.load %arg9[%c48_46, %c0_47] : memref<64x128xf32, #tpu.memory_space<vmem>>, vector<8x128xf32>
    tpu.vector_store %arg9[%c48_46, %c0_47], %52 {strides = array<i32>} : memref<64x128xf32, #tpu.memory_space<vmem>>, vector<8x128xf32>,
    %c56 = arith.constant 56 : index
    %c0_48 = arith.constant 0 : index
    %54 = vector.load %arg9[%c56, %c0_48] : memref<64x128xf32, #tpu.memory_space<vmem>>, vector<8x128xf32>
    %cst_49 = arith.constant dense<0.000000e+00> : vector<8x128xf32>
    %55 = tpu.matmul %52, %10, %cst_49 {dimension_numbers = #tpu.dot_dimension_numbers<[1], [0], [0], [1], [0, 0, 1, 1], [], []>} : vector<8x128xf32>, vector<128x128xf32>, vector<8x128xf32> -> vector<8x128xf32>
    %56 = arith.addf %54, %55 : vector<8x128xf32>
    %cst_50 = arith.constant 0.000000e+00 : f32
    %57 = vector.broadcast %cst_50 : f32 to vector<8x128xf32>
    %58 = arith.maximumf %56, %57 : vector<8x128xf32>
    %c56_51 = arith.constant 56 : index
    %c0_52 = arith.constant 0 : index
    %59 = vector.load %arg9[%c56_51, %c0_52] : memref<64x128xf32, #tpu.memory_space<vmem>>, vector<8x128xf32>
    tpu.vector_store %arg9[%c56_51, %c0_52], %58 {strides = array<i32>} : memref<64x128xf32, #tpu.memory_space<vmem>>, vector<8x128xf32>,
    %c0_53 = arith.constant 0 : index
    %c0_54 = arith.constant 0 : index
    %60 = vector.load %arg8[%c0_53, %c0_54] : memref<8x128xf32, #tpu.memory_space<vmem>>, vector<8x128xf32>
    tpu.vector_store %arg8[%c0_53, %c0_54], %58 {strides = array<i32>} : memref<8x128xf32, #tpu.memory_space<vmem>>, vector<8x128xf32>,
    %c0_55 = arith.constant 0 : index
    %c0_56 = arith.constant 0 : index
    %61 = vector.load %arg9[%c0_55, %c0_56] : memref<64x128xf32, #tpu.memory_space<vmem>>, vector<64x128xf32>
    %c0_57 = arith.constant 0 : index
    %c0_58 = arith.constant 0 : index
    %62 = vector.load %arg5[%c0_57, %c0_58] : memref<128x128xf32, #tpu.memory_space<vmem>>, vector<128x128xf32>
    %cst_59 = arith.constant dense<0.000000e+00> : vector<64x128xf32>
    %63 = tpu.matmul %61, %62, %cst_59 {dimension_numbers = #tpu.dot_dimension_numbers<[1], [0], [0], [1], [0, 0, 1, 1], [], []>} : vector<64x128xf32>, vector<128x128xf32>, vector<64x128xf32> -> vector<64x128xf32>
    %c0_60 = arith.constant 0 : index
    %c0_61 = arith.constant 0 : index
    %64 = vector.load %arg6[%c0_60, %c0_61] : memref<1x128xf32, #tpu.memory_space<vmem>>, vector<1x128xf32>
    %65 = vector.broadcast %64 : vector<1x128xf32> to vector<64x128xf32>
    %66 = arith.addf %63, %65 : vector<64x128xf32>
    %c0_62 = arith.constant 0 : index
    %c0_63 = arith.constant 0 : index
    %67 = vector.load %arg7[%c0_62, %c0_63] : memref<64x128xf32, #tpu.memory_space<vmem>>, vector<64x128xf32>
    tpu.vector_store %arg7[%c0_62, %c0_63], %66 {strides = array<i32>} : memref<64x128xf32, #tpu.memory_space<vmem>>, vector<64x128xf32>,
    return
  }
  func.func @transform_0(%arg0: i32) -> (i32, i32) {
    %c0_i32 = arith.constant 0 : i32
    %c0_i32_0 = arith.constant 0 : i32
    return %arg0, %c0_i32 : i32, i32
  }
  func.func @transform_1(%arg0: i32) -> (i32, i32) {
    %c0_i32 = arith.constant 0 : i32
    %c0_i32_0 = arith.constant 0 : i32
    %c0_i32_1 = arith.constant 0 : i32
    return %c0_i32, %c0_i32_0 : i32, i32
  }
  func.func @transform_2(%arg0: i32) -> (i32, i32) {
    %c0_i32 = arith.constant 0 : i32
    %c0_i32_0 = arith.constant 0 : i32
    %c0_i32_1 = arith.constant 0 : i32
    return %c0_i32, %c0_i32_0 : i32, i32
  }
  func.func @transform_3(%arg0: i32) -> (i32, i32) {
    %c0_i32 = arith.constant 0 : i32
    %c0_i32_0 = arith.constant 0 : i32
    %c0_i32_1 = arith.constant 0 : i32
    return %c0_i32, %c0_i32_0 : i32, i32
  }
  func.func @transform_4(%arg0: i32) -> (i32, i32) {
    %c0_i32 = arith.constant 0 : i32
    %c0_i32_0 = arith.constant 0 : i32
    %c0_i32_1 = arith.constant 0 : i32
    return %c0_i32, %c0_i32_0 : i32, i32
  }
  func.func @transform_5(%arg0: i32) -> (i32, i32) {
    %c0_i32 = arith.constant 0 : i32
    %c0_i32_0 = arith.constant 0 : i32
    %c0_i32_1 = arith.constant 0 : i32
    return %c0_i32, %c0_i32_0 : i32, i32
  }
  func.func @transform_6(%arg0: i32) -> (i32, i32) {
    %c0_i32 = arith.constant 0 : i32
    %c0_i32_0 = arith.constant 0 : i32
    return %arg0, %c0_i32 : i32, i32
  }
}

</mosaic_0001>

<bundles_post_ra>
// kernel: rnn_model_forward.1
= control target key start
LH: loop header
LB: loop body
LE: loop exit
PB: predicated region body
PF: predicated region fallthrough
CT: control target
= control target key end

     0   :  { %vm42_vm0 = vcmask 130048   ;;  %v420_v35 = vmov 0.0   ;;  %s800_s3 = inlined_call_operand.vmem [shape: f32[128,128], index: 3, kind: input, shape index: {}]   ;;  %s801_s1 = inlined_call_operand.vmem [shape: f32[16,128], index: 1, kind: input, shape index: {}]   ;;  %s802_s0 = inlined_call_operand.vmem [shape: f32[64,16], index: 0, kind: input, shape index: {}]   ;;  %s803_s4 = inlined_call_operand.vmem [shape: f32[128,128], index: 4, kind: input, shape index: {}]   ;;  %s804_s2 = inlined_call_operand.vmem [shape: f32[1,128], index: 2, kind: input, shape index: {}]   ;;  %s805_s5 = inlined_call_operand.vmem [shape: f32[1,128], index: 5, kind: input, shape index: {}]   ;;  %s806_s6 = inlined_call_operand.vmem [shape: f32[64,128], index: 6, kind: output, shape index: {}]  }
   0x1   :  { %v459_v0 = vld [vmem:[%s800_s3 + $0x78] sm:$0xff]  ;;  %v464_v1 = vld [vmem:[%s800_s3 + $0x70] sm:$0xff]  ;;  %v471_v2 = vld [vmem:[%s800_s3 + $0x68] sm:$0xff] }
   0x2   :  { %134 = vmatpush.msra.mxu1 %v459_v0  ;;  %158 = vmatpush.msra.mxu3 %v459_v0  ;;  %v478_v3 = vld [vmem:[%s800_s3 + $0x60] sm:$0xff]  ;;  %v37_v4 = vld [vmem:[%s801_s1 + $0x8] sm:$0xff]  ;;  %v493_v7 = vld [vmem:[%s800_s3 + $0x58] sm:$0xff] }
   0x3   :  { %81 = vmatpush.msra.mxu0 %v37_v4  ;;  %v36_v5 = vld [vmem:[%s801_s1] sm:$0xff]  ;;  %415 = vmatpush.msra.mxu2 %v37_v4  ;;  %v349_v9 = vld [vmem:[%s803_s4 + $0x78] sm:$0xff]  ;;  %v506_v10 = vld [vmem:[%s800_s3 + $0x50] sm:$0xff] }
   0x4   :  { %135 = vmatpush.msra.mxu1 %v464_v1  ;;  %159 = vmatpush.msra.mxu3 %v464_v1  ;;  %v28_v6 = vld [vmem:[%s802_s0] sm:$0xff]  ;;  %v348_v11 = vld [vmem:[%s803_s4 + $0x70] sm:$0xff]  ;;  %v517_v12 = vld [vmem:[%s800_s3 + $0x48] sm:$0xff] }
   0x5   :  { %v32_v8 = vld [vmem:[%s802_s0 + $0x20] sm:$0xff]  ;;  %82 = vmatpush.msra.mxu0 %v36_v5  ;;  %416 = vmatpush.msra.mxu2 %v36_v5  ;;  %v347_v13 = vld [vmem:[%s803_s4 + $0x68] sm:$0xff]  ;;  %v539_v16 = vld [vmem:[%s800_s3 + $0x38] sm:$0xff] }
   0x6   :  { %136 = vmatpush.msra.mxu1 %v471_v2  ;;  %160 = vmatpush.msra.mxu3 %v471_v2  ;;  %v528_v14 = vld [vmem:[%s800_s3 + $0x40] sm:$0xff]  ;;  %v33_v17 = vld [vmem:[%s802_s0 + $0x28] sm:$0xff]  ;;  %v345_v18 = vld [vmem:[%s803_s4 + $0x58] sm:$0xff] }
   0x7   :  { %407 = vmatmul.msk.f32.vlgmr.msra.gmra.mxu0 %vm42_vm0, %v28_v6  ;;  %411 = vmatmul.msk.f32.vlgmr.msra.gmra.mxu2 %vm42_vm0, %v32_v8  ;;  %v346_v15 = vld [vmem:[%s803_s4 + $0x60] sm:$0xff]  ;;  %v553_v19 = vld [vmem:[%s800_s3 + $0x30] sm:$0xff]  ;;  %v564_v21 = vld [vmem:[%s800_s3 + $0x28] sm:$0xff] }
   0x8   :  { %137 = vmatpush.msra.mxu1 %v478_v3  ;;  %354 = vmatpush.msrb.mxu2 %v349_v9  ;;  %v344_v20 = vld [vmem:[%s803_s4 + $0x50] sm:$0xff]  ;;  %v343_v22 = vld [vmem:[%s803_s4 + $0x48] sm:$0xff]  ;;  %v575_v23 = vld [vmem:[%s800_s3 + $0x20] sm:$0xff] }
   0x9   :  { %161 = vmatpush.msra.mxu3 %v478_v3  ;;  %230 = vmatpush.msrb.mxu0 %v459_v0  ;;  %v342_v24 = vld [vmem:[%s803_s4 + $0x40] sm:$0xff]  ;;  %v586_v25 = vld [vmem:[%s800_s3 + $0x18] sm:$0xff]  ;;  %v34_v26 = vld [vmem:[%s802_s0 + $0x30] sm:$0xff] }
   0xa   :  { %138 = vmatpush.msra.mxu1 %v493_v7  ;;  %355 = vmatpush.msrb.mxu2 %v348_v11  ;;  %v341_v27 = vld [vmem:[%s803_s4 + $0x38] sm:$0xff]  ;;  %v600_v28 = vld [vmem:[%s800_s3 + $0x10] sm:$0xff]  ;;  %v611_v30 = vld [vmem:[%s800_s3 + $0x8] sm:$0xff] }
   0xb   :  { %162 = vmatpush.msra.mxu3 %v493_v7  ;;  %231 = vmatpush.msrb.mxu0 %v464_v1  ;;  %v340_v29 = vld [vmem:[%s803_s4 + $0x30] sm:$0xff]  ;;  %v339_v31 = vld [vmem:[%s803_s4 + $0x28] sm:$0xff]  ;;  %v622_v32 = vld [vmem:[%s800_s3] sm:$0xff] }
   0xc   :  { %139 = vmatpush.msra.mxu1 %v506_v10  ;;  %356 = vmatpush.msrb.mxu2 %v347_v13  ;;  %v338_v33 = vld [vmem:[%s803_s4 + $0x20] sm:$0xff]  ;;  %v35_v34 = vld [vmem:[%s802_s0 + $0x38] sm:$0xff]  ;;  %v336_v37 = vld [vmem:[%s803_s4 + $0x10] sm:$0xff] }
   0xd   :  { %163 = vmatpush.msra.mxu3 %v506_v10  ;;  %232 = vmatpush.msrb.mxu0 %v471_v2  ;;  %v337_v36 = vld [vmem:[%s803_s4 + $0x18] sm:$0xff]  ;;  %v335_v38 = vld [vmem:[%s803_s4 + $0x8] sm:$0xff]  ;;  %v334_v39 = vld [vmem:[%s803_s4] sm:$0xff] }
   0xe   :  { %140 = vmatpush.msra.mxu1 %v517_v12  ;;  %357 = vmatpush.msrb.mxu2 %v346_v15  ;;  %v29_v40 = vld [vmem:[%s802_s0 + $0x8] sm:$0xff]  ;;  %v729_v41 = vld [vmem:[%s804_s2] ss:$0 sm:$0xff]  ;;  %v30_v49 = vld [vmem:[%s802_s0 + $0x10] sm:$0xff] }
   0xf   :  { %164 = vmatpush.msra.mxu3 %v517_v12  ;;  %412 = vmatmul.msk.f32.gmra.mxu2 %vm42_vm0, %v33_v17  ;;  %v756_v54 = vld [vmem:[%s805_s5] ss:$0 sm:$0xff]  ;;  %v31_v60 = vld [vmem:[%s802_s0 + $0x18] sm:$0xff] }
  0x10   :  { %141 = vmatpush.msra.mxu1 %v528_v14  ;;  %358 = vmatpush.msrb.mxu2 %v345_v18 }
  0x11   :  { %165 = vmatpush.msra.mxu3 %v528_v14  ;;  %233 = vmatpush.msrb.mxu0 %v478_v3 }
  0x12   :  { %142 = vmatpush.msra.mxu1 %v539_v16  ;;  %359 = vmatpush.msrb.mxu2 %v344_v20 }
  0x13   :  { %166 = vmatpush.msra.mxu3 %v539_v16  ;;  %234 = vmatpush.msrb.mxu0 %v493_v7 }
  0x14   :  { %143 = vmatpush.msra.mxu1 %v553_v19  ;;  %360 = vmatpush.msrb.mxu2 %v343_v22 }
  0x15   :  { %167 = vmatpush.msra.mxu3 %v553_v19  ;;  %235 = vmatpush.msrb.mxu0 %v506_v10 }
  0x16   :  { %144 = vmatpush.msra.mxu1 %v564_v21  ;;  %361 = vmatpush.msrb.mxu2 %v342_v24 }
  0x17   :  { %168 = vmatpush.msra.mxu3 %v564_v21  ;;  %413 = vmatmul.msk.f32.gmra.mxu2 %vm42_vm0, %v34_v26 }
  0x18   :  { %145 = vmatpush.msra.mxu1 %v575_v23  ;;  %362 = vmatpush.msrb.mxu2 %v341_v27 }
  0x19   :  { %169 = vmatpush.msra.mxu3 %v575_v23  ;;  %236 = vmatpush.msrb.mxu0 %v517_v12 }
  0x1a   :  { %146 = vmatpush.msra.mxu1 %v586_v25  ;;  %363 = vmatpush.msrb.mxu2 %v340_v29 }
  0x1b   :  { %170 = vmatpush.msra.mxu3 %v586_v25  ;;  %237 = vmatpush.msrb.mxu0 %v528_v14 }
  0x1c   :  { %147 = vmatpush.msra.mxu1 %v600_v28  ;;  %364 = vmatpush.msrb.mxu2 %v339_v31 }
  0x1d   :  { %171 = vmatpush.msra.mxu3 %v600_v28  ;;  %238 = vmatpush.msrb.mxu0 %v539_v16 }
  0x1e   :  { %148 = vmatpush.msra.mxu1 %v611_v30  ;;  %365 = vmatpush.msrb.mxu2 %v338_v33 }
  0x1f   :  { %414 = vmatmul.msk.f32.gmra.mxu2 %vm42_vm0, %v35_v34  ;;  %172 = vmatpush.msra.mxu3 %v611_v30 }
  0x20   :  { %149 = vmatpush.msra.mxu1 %v622_v32  ;;  %239 = vmatpush.msrb.mxu0 %v553_v19 }
  0x21   :  { %150 = vmatmul.f32.vlgmr.msra.gmra.mxu1 %v420_v35  ;;  %173 = vmatpush.msra.mxu3 %v622_v32 }
  0x22   :  { %206 = vmatpush.msrb.mxu1 %v459_v0  ;;  %240 = vmatpush.msrb.mxu0 %v564_v21 }
  0x23   :  { %182 = vmatpush.msrb.mxu3 %v459_v0  ;;  %366 = vmatpush.msrb.mxu2 %v337_v36 }
  0x24   :  { %207 = vmatpush.msrb.mxu1 %v464_v1  ;;  %241 = vmatpush.msrb.mxu0 %v575_v23 }
  0x25   :  { %183 = vmatpush.msrb.mxu3 %v464_v1  ;;  %367 = vmatpush.msrb.mxu2 %v336_v37 }
  0x26   :  { %208 = vmatpush.msrb.mxu1 %v471_v2  ;;  %242 = vmatpush.msrb.mxu0 %v586_v25 }
  0x27   :  { %184 = vmatpush.msrb.mxu3 %v471_v2  ;;  %368 = vmatpush.msrb.mxu2 %v335_v38 }
  0x28   :  { %209 = vmatpush.msrb.mxu1 %v478_v3  ;;  %243 = vmatpush.msrb.mxu0 %v600_v28 }
  0x29   :  { %185 = vmatpush.msrb.mxu3 %v478_v3  ;;  %369 = vmatpush.msrb.mxu2 %v334_v39 }
  0x2a   :  { %210 = vmatpush.msrb.mxu1 %v493_v7  ;;  %244 = vmatpush.msrb.mxu0 %v611_v30 }
  0x2b   :  { %186 = vmatpush.msrb.mxu3 %v493_v7  ;;  %408 = vmatmul.msk.f32.gmra.mxu0 %vm42_vm0, %v29_v40 }
  0x2c   :  { %211 = vmatpush.msrb.mxu1 %v506_v10  ;;  %245 = vmatpush.msrb.mxu0 %v622_v32 }
  0x2d   :  { %187 = vmatpush.msrb.mxu3 %v506_v10 }
  0x2e   :  { %212 = vmatpush.msrb.mxu1 %v517_v12  ;;  %278 = vmatpush.msra.mxu0 %v459_v0 }
  0x2f   :  { %188 = vmatpush.msrb.mxu3 %v517_v12 }
  0x30   :  { %213 = vmatpush.msrb.mxu1 %v528_v14  ;;  %279 = vmatpush.msra.mxu0 %v464_v1 }
  0x31   :  { %189 = vmatpush.msrb.mxu3 %v528_v14 }
  0x32   :  { %214 = vmatpush.msrb.mxu1 %v539_v16  ;;  %280 = vmatpush.msra.mxu0 %v471_v2 }
  0x33   :  { %190 = vmatpush.msrb.mxu3 %v539_v16  ;;  %409 = vmatmul.msk.f32.gmra.mxu0 %vm42_vm0, %v30_v49 }
  0x34   :  { %215 = vmatpush.msrb.mxu1 %v553_v19  ;;  %281 = vmatpush.msra.mxu0 %v478_v3 }
  0x35   :  { %191 = vmatpush.msrb.mxu3 %v553_v19 }
  0x36   :  { %216 = vmatpush.msrb.mxu1 %v564_v21  ;;  %282 = vmatpush.msra.mxu0 %v493_v7 }
  0x37   :  { %192 = vmatpush.msrb.mxu3 %v564_v21 }
  0x38   :  { %217 = vmatpush.msrb.mxu1 %v575_v23  ;;  %283 = vmatpush.msra.mxu0 %v506_v10 }
  0x39   :  { %193 = vmatpush.msrb.mxu3 %v575_v23 }
  0x3a   :  { %218 = vmatpush.msrb.mxu1 %v586_v25  ;;  %284 = vmatpush.msra.mxu0 %v517_v12 }
  0x3b   :  { %194 = vmatpush.msrb.mxu3 %v586_v25  ;;  %410 = vmatmul.msk.f32.gmra.mxu0 %vm42_vm0, %v31_v60 }
  0x3c   :  { %219 = vmatpush.msrb.mxu1 %v600_v28  ;;  %285 = vmatpush.msra.mxu0 %v528_v14 }
  0x3d   :  { %195 = vmatpush.msrb.mxu3 %v600_v28 }
  0x3e   :  { %220 = vmatpush.msrb.mxu1 %v611_v30  ;;  %286 = vmatpush.msra.mxu0 %v539_v16 }
  0x3f   :  { %196 = vmatpush.msrb.mxu3 %v611_v30 }
  0x40   :  { %221 = vmatpush.msrb.mxu1 %v622_v32  ;;  %287 = vmatpush.msra.mxu0 %v553_v19 }
  0x41   :  { %197 = vmatpush.msrb.mxu3 %v622_v32 }
  0x42   :  { %302 = vmatpush.msra.mxu1 %v459_v0  ;;  %288 = vmatpush.msra.mxu0 %v564_v21 }
  0x44   :  { %303 = vmatpush.msra.mxu1 %v464_v1  ;;  %289 = vmatpush.msra.mxu0 %v575_v23 }
  0x46   :  { %304 = vmatpush.msra.mxu1 %v471_v2  ;;  %290 = vmatpush.msra.mxu0 %v586_v25 }
  0x48   :  { %305 = vmatpush.msra.mxu1 %v478_v3  ;;  %291 = vmatpush.msra.mxu0 %v600_v28 }
  0x4a   :  { %306 = vmatpush.msra.mxu1 %v493_v7  ;;  %292 = vmatpush.msra.mxu0 %v611_v30 }
  0x4c   :  { %307 = vmatpush.msra.mxu1 %v506_v10  ;;  %293 = vmatpush.msra.mxu0 %v622_v32 }
  0x4e   :  { %308 = vmatpush.msra.mxu1 %v517_v12 }
  0x50   :  { %309 = vmatpush.msra.mxu1 %v528_v14 }
  0x52   :  { %310 = vmatpush.msra.mxu1 %v539_v16 }
  0x54   :  { %311 = vmatpush.msra.mxu1 %v553_v19 }
  0x56   :  { %312 = vmatpush.msra.mxu1 %v564_v21 }
  0x58   :  { %313 = vmatpush.msra.mxu1 %v575_v23 }
  0x5a   :  { %314 = vmatpush.msra.mxu1 %v586_v25 }
  0x5c   :  { %315 = vmatpush.msra.mxu1 %v600_v28 }
  0x5e   :  { %316 = vmatpush.msra.mxu1 %v611_v30 }
  0x60   :  { %317 = vmatpush.msra.mxu1 %v622_v32 }
  0x84   :  { %v84_v42 = vpop.f32.mrf.mxu0 }
  0x85   :  { %v85_v43 = vadd.f32 %v729_v41, %v84_v42 }
  0x8a   :  { %v96_v47 = vpop.f32.mrf.mxu2 }
  0x8b   :  { %v97_v11 = vadd.f32 %v729_v41, %v96_v47 }
  0x92   :  { %v99_v48 = vpop.f32.mrf.mxu2 }
  0x93   :  { %v100_v17 = vadd.f32 %v729_v41, %v99_v48 }
  0x9a   :  { %v102_v50 = vpop.f32.mrf.mxu2 }
  0x9e   :  { %v151_v44 = vpop.f32.mrf.mxu1 }
  0x9f   :  { %v154_v45 = vadd.f32 %v151_v44, %v85_v43 }
  0xa1   :  { %v155_v46 = vmax.f32 %v154_v45, 0.0 }
  0xa2   :  { %v105_v51 = vpop.f32.mrf.mxu2 }
  0xa3   :  { %174 = vmatmul.f32.vlgmr.msra.gmra.mxu3 %v155_v46  ;;  %370 = vmatmul.f32.vlgmr.msrb.gmra.mxu2 %v155_v46  ;;  %v106_v29 = vadd.f32 %v729_v41, %v105_v51 }
  0xa4   :  { %254 = vmatpush.msra.mxu3 %v459_v0 }
  0xa6   :  { %255 = vmatpush.msra.mxu3 %v464_v1 }
  0xa8   :  { %256 = vmatpush.msra.mxu3 %v471_v2  ;;  %v87_v52 = vpop.f32.mrf.mxu0 }
  0xa9   :  { %v88_v53 = vadd.f32 %v729_v41, %v87_v52 }
  0xaa   :  { %257 = vmatpush.msra.mxu3 %v478_v3 }
  0xac   :  { %258 = vmatpush.msra.mxu3 %v493_v7 }
  0xae   :  { %259 = vmatpush.msra.mxu3 %v506_v10 }
  0xb0   :  { %260 = vmatpush.msra.mxu3 %v517_v12  ;;  %v90_v61 = vpop.f32.mrf.mxu0 }
  0xb1   :  { %v91_v62 = vadd.f32 %v729_v41, %v90_v61 }
  0xb2   :  { %261 = vmatpush.msra.mxu3 %v528_v14 }
  0xb4   :  { %262 = vmatpush.msra.mxu3 %v539_v16 }
  0xb6   :  { %263 = vmatpush.msra.mxu3 %v553_v19 }
  0xb8   :  { %264 = vmatpush.msra.mxu3 %v564_v21  ;;  %v93_v4 = vpop.f32.mrf.mxu0 }
  0xb9   :  { %v94_v5 = vadd.f32 %v729_v41, %v93_v4 }
  0xba   :  { %265 = vmatpush.msra.mxu3 %v575_v23  ;;  %v103_v23 = vadd.f32 %v729_v41, %v102_v50 }
  0xbc   :  { %266 = vmatpush.msra.mxu3 %v586_v25 }
  0xbe   :  { %267 = vmatpush.msra.mxu3 %v600_v28 }
  0xc0   :  { %268 = vmatpush.msra.mxu3 %v611_v30 }
  0xc2   :  { %269 = vmatpush.msra.mxu3 %v622_v32 }
 0x126   :  { %v175_v55 = vpop.f32.mrf.mxu3  ;;  %v371_v56 = vpop.f32.mrf.mxu2 }
 0x127   :  { %v178_v57 = vadd.f32 %v175_v55, %v88_v53  ;;  %v372_v58 = vadd.f32 %v756_v54, %v371_v56 }
 0x129   :  { %v179_v59 = vmax.f32 %v178_v57, 0.0  ;;  %395 = vst [vmem:[%s806_s6] sm:$0xff] %v372_v58 }
 0x12b   :  { %198 = vmatmul.f32.vlgmr.msrb.gmra.mxu3 %v179_v59  ;;  %373 = vmatmul.f32.gmra.mxu2 %v179_v59 }
 0x1ae   :  { %v199_v63 = vpop.f32.mrf.mxu3  ;;  %v374_v0 = vpop.f32.mrf.mxu2 }
 0x1af   :  { %v202_v1 = vadd.f32 %v199_v63, %v91_v62  ;;  %v375_v2 = vadd.f32 %v756_v54, %v374_v0 }
 0x1b1   :  { %v203_v3 = vmax.f32 %v202_v1, 0.0  ;;  %396 = vst [vmem:[%s806_s6 + $0x8] sm:$0xff] %v375_v2 }
 0x1b3   :  { %222 = vmatmul.f32.vlgmr.msrb.gmra.mxu1 %v203_v3  ;;  %376 = vmatmul.f32.gmra.mxu2 %v203_v3 }
 0x230   :  { %v223_v6 = vpop.f32.mrf.mxu1 }
 0x231   :  { %v226_v7 = vadd.f32 %v223_v6, %v94_v5 }
 0x233   :  { %v227_v8 = vmax.f32 %v226_v7, 0.0 }
 0x235   :  { %246 = vmatmul.f32.vlgmr.msrb.gmra.mxu0 %v227_v8  ;;  %379 = vmatmul.f32.gmra.mxu2 %v227_v8 }
 0x236   :  { %v377_v9 = vpop.f32.mrf.mxu2 }
 0x237   :  { %v378_v10 = vadd.f32 %v756_v54, %v377_v9 }
 0x239   :  { %397 = vst [vmem:[%s806_s6 + $0x10] sm:$0xff] %v378_v10 }
 0x2b2   :  { %v247_v12 = vpop.f32.mrf.mxu0 }
 0x2b3   :  { %v250_v13 = vadd.f32 %v247_v12, %v97_v11 }
 0x2b5   :  { %v251_v14 = vmax.f32 %v250_v13, 0.0 }
 0x2b7   :  { %270 = vmatmul.f32.vlgmr.msra.gmra.mxu3 %v251_v14  ;;  %382 = vmatmul.f32.gmra.mxu2 %v251_v14 }
 0x2b8   :  { %v380_v15 = vpop.f32.mrf.mxu2 }
 0x2b9   :  { %v381_v16 = vadd.f32 %v756_v54, %v380_v15 }
 0x2bb   :  { %398 = vst [vmem:[%s806_s6 + $0x18] sm:$0xff] %v381_v16 }
 0x33a   :  { %v271_v18 = vpop.f32.mrf.mxu3  ;;  %v383_v19 = vpop.f32.mrf.mxu2 }
 0x33b   :  { %v274_v20 = vadd.f32 %v271_v18, %v100_v17  ;;  %v384_v21 = vadd.f32 %v756_v54, %v383_v19 }
 0x33d   :  { %v275_v22 = vmax.f32 %v274_v20, 0.0  ;;  %399 = vst [vmem:[%s806_s6 + $0x20] sm:$0xff] %v384_v21 }
 0x33f   :  { %294 = vmatmul.f32.vlgmr.msra.gmra.mxu0 %v275_v22  ;;  %385 = vmatmul.f32.gmra.mxu2 %v275_v22 }
 0x3bc   :  { %v295_v24 = vpop.f32.mrf.mxu0 }
 0x3bd   :  { %v298_v25 = vadd.f32 %v295_v24, %v103_v23 }
 0x3bf   :  { %v299_v26 = vmax.f32 %v298_v25, 0.0 }
 0x3c1   :  { %318 = vmatmul.f32.vlgmr.msra.gmra.mxu1 %v299_v26  ;;  %388 = vmatmul.f32.gmra.mxu2 %v299_v26 }
 0x3c2   :  { %v386_v27 = vpop.f32.mrf.mxu2 }
 0x3c3   :  { %v387_v28 = vadd.f32 %v756_v54, %v386_v27 }
 0x3c5   :  { %400 = vst [vmem:[%s806_s6 + $0x28] sm:$0xff] %v387_v28 }
 0x43e   :  { %v319_v30 = vpop.f32.mrf.mxu1 }
 0x43f   :  { %v322_v31 = vadd.f32 %v319_v30, %v106_v29 }
 0x441   :  { %v323_v32 = vmax.f32 %v322_v31, 0.0 }
 0x443   :  { %391 = vmatmul.f32.gmra.mxu2 %v323_v32 }
 0x444   :  { %v389_v33 = vpop.f32.mrf.mxu2 }
 0x445   :  { %v390_v34 = vadd.f32 %v756_v54, %v389_v33 }
 0x447   :  { %401 = vst [vmem:[%s806_s6 + $0x30] sm:$0xff] %v390_v34 }
 0x4c6   :  { %v392_v35 = vpop.f32.mrf.mxu2 }
 0x4c7   :  { %v393_v36 = vadd.f32 %v756_v54, %v392_v35 }
 0x4c9   :  { %402 = vst [vmem:[%s806_s6 + $0x38] sm:$0xff] %v393_v36 }

</bundles_post_ra>
